<compile_context>
chip_gen: v6e
topology: v6e:2x2x1
jax: 0.10.0
libtpu: 0.0.40
codegen_flags: <defaults>
</compile_context>

<pallas_src>
import functools

import jax
import jax.numpy as jnp
from jax.experimental import pallas as pl
from jax.experimental.pallas import tpu as pltpu


def _integrator_kernel(n_in, c_x, tb, *refs):
    """out[b] = concat(x[b], sum_t W_t @ in_t[b] + bias) along channels.

    refs layout: w_0..w_{n_in-1}, bias, [x], in_0..in_{n_in-1}, out
      w_t:  (C_out, C_t)          bias: (C_out, 1)
      x:    (tb, C_x,  TS)        in_t: (tb, C_t, TS)
      out:  (tb, C_x + C_out, TS)          -- spatial on the lane axis
    """
    w_refs = refs[:n_in]
    b_ref = refs[n_in]
    pos = n_in + 1
    x_ref = None
    if c_x > 0:
        x_ref = refs[pos]
        pos += 1
    in_refs = refs[pos:pos + n_in]
    o_ref = refs[pos + n_in]

    for b in range(tb):  # tb is small & static; each b is an independent matmul
        acc = jnp.dot(w_refs[0][...], in_refs[0][b],
                      preferred_element_type=jnp.float32)
        for t in range(1, n_in):
            acc = acc + jnp.dot(w_refs[t][...], in_refs[t][b],
                                preferred_element_type=jnp.float32)
        acc = acc + b_ref[...]          # bias add on the f32 accumulator
        if c_x > 0:
            o_ref[b, :c_x, :] = x_ref[b].astype(o_ref.dtype)
            o_ref[b, c_x:, :] = acc.astype(o_ref.dtype)
        else:
            o_ref[b, :, :] = acc.astype(o_ref.dtype)


def _choose_tiles(B, S, bytes_per_col, *, vmem_budget=8 << 20,
                  min_block_bytes=1 << 20):
    """Pick (batch_tile, spatial_tile).

    bytes_per_col: bytes of VMEM block data per spatial column per batch
    element (inputs + optional x + output). The double-buffered block set is
    kept under ~vmem_budget; blocks are grown toward min_block_bytes to
    amortize the ~0.35 us per-grid-step overhead.
    """
    if S <= 128:
        ts = S                                   # full extent; always legal
    else:
        s_ceil = -(-S // 128) * 128
        ts_budget = max(128, (vmem_budget // (2 * bytes_per_col)) // 128 * 128)
        ts = min(s_ceil, ts_budget, 8192)        # multiple of 128
        if ts >= S:
            ts = S                               # single full-extent block
    n_spatial = -(-S // ts)

    tb = 1
    per_b = ts * bytes_per_col
    if B > 1 and per_b < min_block_bytes:
        want = min(B,
                   max(1, min_block_bytes // per_b),
                   max(1, vmem_budget // (2 * per_b)))
        if n_spatial == 1:
            # keep >= 2 grid steps so v7x's 2nd TensorCore has work
            want = min(want, max(1, B // 2))
        divisors = [d for d in range(1, B + 1) if B % d == 0]
        tb = max([d for d in divisors if d <= want], default=1)
    return tb, ts


def integrator_conv1x1(weight, bias, inputs_list, x=None, *, ts=None, tb=None):
    """1x1 conv over (virtually concatenated) NCHW inputs, fused concat with x.

    weight: (C_out, sum_k C_k), bias: (C_out,)
    inputs_list: list of (B, C_k, H, W) tensors (the virtual channel concat)
    x: optional (B, C_x, H, W), placed in front of the conv output channels.
    """
    inputs_list = list(inputs_list)
    B, _, H, W = inputs_list[0].shape
    S = H * W
    C_out = int(bias.shape[0])
    c_splits = [int(t.shape[1]) for t in inputs_list]
    assert weight.shape == (C_out, sum(c_splits))
    dtype = inputs_list[0].dtype
    itemsize = jnp.dtype(dtype).itemsize
    sublane_pack = 32 // itemsize            # 8 for f32, 16 for bf16

    weight = weight.astype(dtype)            # bf16 activations -> bf16 weights
    bias2d = bias.astype(jnp.float32).reshape(C_out, 1)

    C_x = 0 if x is None else int(x.shape[1])
    # Fuse cat([x, out], dim=1) only when the channel split is sublane-aligned
    # (unaligned split would force masked sublane stores on the conv slab).
    fuse_x = (x is not None) and (C_x % sublane_pack == 0)
    C_tot = (C_x if fuse_x else 0) + C_out

    bytes_per_col = itemsize * (sum(c_splits) + (2 * C_x if fuse_x else 0) + C_out)
    auto_tb, auto_ts = _choose_tiles(B, S, bytes_per_col)
    ts = auto_ts if ts is None else int(ts)
    tb = auto_tb if tb is None else int(tb)
    assert ts == S or ts % 128 == 0, \
        "spatial tile must be a multiple of 128 or equal the full spatial extent"
    assert B % tb == 0, "batch tile must divide the batch"

    grid = (B // tb, pl.cdiv(S, ts))

    args, in_specs = [], []
    off = 0
    for c_k in c_splits:                     # weight column slices (fused content matmul)
        args.append(weight[:, off:off + c_k])
        off += c_k
        in_specs.append(pl.BlockSpec((C_out, c_k), lambda b, j: (0, 0)))
    args.append(bias2d)
    in_specs.append(pl.BlockSpec((C_out, 1), lambda b, j: (0, 0)))
    if fuse_x:
        args.append(x.reshape(B, C_x, S))    # trailing-dim merge: no data movement
        in_specs.append(pl.BlockSpec((tb, C_x, ts), lambda b, j: (b, 0, j)))
    for t, c_k in zip(inputs_list, c_splits):
        args.append(t.reshape(B, c_k, S))
        in_specs.append(pl.BlockSpec((tb, c_k, ts), lambda b, j: (b, 0, j)))

    out_spec = pl.BlockSpec((tb, C_tot, ts), lambda b, j: (b, 0, j))

    cost = pl.CostEstimate(
        flops=2 * B * S * sum(c_splits) * C_out,
        transcendentals=0,
        bytes_accessed=itemsize * (B * S * (sum(c_splits)
                                            + (C_x if fuse_x else 0) + C_tot)
                                   + C_out * sum(c_splits) + C_out),
    )

    out3 = pl.pallas_call(
        functools.partial(_integrator_kernel, len(c_splits),
                          C_x if fuse_x else 0, tb),
        out_shape=jax.ShapeDtypeStruct((B, C_tot, S), dtype),
        grid_spec=pltpu.PrefetchScalarGridSpec(
            num_scalar_prefetch=0,
            grid=grid,
            in_specs=in_specs,
            out_specs=out_spec),
        compiler_params=pltpu.CompilerParams(
            dimension_semantics=("parallel", "parallel")),
        cost_estimate=cost,
    )(*args)
    out = out3.reshape(B, C_tot, H, W)

    if x is not None and not fuse_x:
        # TODO(synk): unaligned channel split (C_x not a multiple of the sublane
        # pack) falls back to an XLA concat instead of the fused in-kernel store.
        out = jnp.concatenate([x, out], axis=1)
    return out


class IntegratorPallas:
    """JAX/Pallas port of Integrator(C, norm='none', activ='none')."""

    def __init__(self, C, C_in=None, C_content=0, key=None):
        C_in_total = (C_in or C) + C_content
        self.C = C
        self.C_in = C_in_total
        key = key if key is not None else jax.random.PRNGKey(0)
        kw, kb = jax.random.split(key)
        # PyTorch Conv2d default init: U(-1/sqrt(fan_in), 1/sqrt(fan_in)), fan_in = C_in*1*1
        bound = 1.0 / (C_in_total ** 0.5)
        # stored as (C_out, C_in): kernel computes W @ x per spatial column
        self.weight = jax.random.uniform(kw, (C, C_in_total), jnp.float32, -bound, bound)
        self.bias = jax.random.uniform(kb, (C,), jnp.float32, -bound, bound)

    def __call__(self, comps, x=None, content=None):
        # comps: (B, C_comps, H, W) NCHW, same as PyTorch
        inputs = [comps]
        if content is not None:
            # fused in-kernel as a second matmul on weight column slices (no HBM concat)
            inputs.append(content)
        assert sum(t.shape[1] for t in inputs) == self.C_in
        return integrator_conv1x1(self.weight, self.bias, inputs, x=x)


if __name__ == "__main__":
    key = jax.random.PRNGKey(0)
    k_comps, k_x, k_content, k_p1, k_p2 = jax.random.split(key, 5)

    B, C, H, W = 2, 32, 16, 16
    comps = jax.random.normal(k_comps, (B, C, H, W), jnp.float32)
    x_extra = jax.random.normal(k_x, (B, C, H, W), jnp.float32)

    integ = IntegratorPallas(C, key=k_p1)

    # Path 1: conv only (x=None, content=None).
    out_conv = jax.block_until_ready(integ(comps))
    assert out_conv.shape == (B, C, H, W), out_conv.shape
    ref_conv = jnp.einsum("oi,bihw->bohw", integ.weight, comps) \
        + integ.bias[None, :, None, None]
    assert jnp.allclose(out_conv, ref_conv, atol=1e-4, rtol=1e-4)

    # Path 2: conv with fused channel-concat of x.
    out_cat = jax.block_until_ready(integ(comps, x=x_extra))
    assert out_cat.shape == (B, 2 * C, H, W), out_cat.shape
    ref_cat = jnp.concatenate([x_extra, ref_conv], axis=1)
    assert jnp.allclose(out_cat, ref_cat, atol=1e-4, rtol=1e-4)

    # Path 3: content fused in-kernel as a second matmul (no wrapper concat).
    C_content = 8
    integ_c = IntegratorPallas(C, C_content=C_content, key=k_p2)
    content = jax.random.normal(k_content, (B, C_content, H, W), jnp.float32)
    out_c = jax.block_until_ready(integ_c(comps, content=content))
    assert out_c.shape == (B, C, H, W), out_c.shape
    ref_in = jnp.concatenate([comps, content], axis=1)
    ref_c = jnp.einsum("oi,bihw->bohw", integ_c.weight, ref_in) \
        + integ_c.bias[None, :, None, None]
    assert jnp.allclose(out_c, ref_c, atol=1e-4, rtol=1e-4)

    # Path 4: ragged last spatial block (S not a multiple of the forced tile).
    H2, W2 = 20, 20   # S = 400 -> 4 spatial blocks of 128, last one masked
    comps2 = jax.random.normal(k_comps, (B, C, H2, W2), jnp.float32)
    out2 = jax.block_until_ready(
        integrator_conv1x1(integ.weight, integ.bias, [comps2], ts=128))
    ref2 = jnp.einsum("oi,bihw->bohw", integ.weight, comps2) \
        + integ.bias[None, :, None, None]
    assert jnp.allclose(out2, ref2, atol=1e-4, rtol=1e-4)

    print("KERNEL_OK")
</pallas_src>

<mosaic_0001>
module attributes {stable_mosaic.version = 11 : i64} {
  func.func @_integrator_kernel(%arg0: i32, %arg1: i32, %arg2: memref<32x32xf32, #tpu.memory_space<vmem>>, %arg3: memref<32x1xf32, #tpu.memory_space<vmem>>, %arg4: memref<1x32x256xf32, #tpu.memory_space<vmem>>, %arg5: memref<1x32x256xf32, #tpu.memory_space<vmem>>) attributes {dimension_semantics = [#tpu.dimension_semantics<parallel>, #tpu.dimension_semantics<parallel>], iteration_bounds = array<i64: 2, 1>, scalar_prefetch = 0 : i64, scratch_operands = 0 : i64, tpu.core_type = #tpu.core_type<tc>, window_params = [{pipeline_mode = #tpu.pipeline_mode<synchronous>, transform_indices = @transform_0, window_bounds = array<i64: 32, 32>}, {pipeline_mode = #tpu.pipeline_mode<synchronous>, transform_indices = @transform_1, window_bounds = array<i64: 32, 1>}, {transform_indices = @transform_2, window_bounds = array<i64: 1, 32, 256>}, {transform_indices = @transform_3, window_bounds = array<i64: 1, 32, 256>}]} {
    %c0 = arith.constant 0 : index
    %c0_0 = arith.constant 0 : index
    %0 = vector.load %arg2[%c0, %c0_0] : memref<32x32xf32, #tpu.memory_space<vmem>>, vector<32x32xf32>
    %c0_1 = arith.constant 0 : index
    %c0_2 = arith.constant 0 : index
    %c0_3 = arith.constant 0 : index
    %1 = vector.load %arg4[%c0_1, %c0_2, %c0_3] : memref<1x32x256xf32, #tpu.memory_space<vmem>>, vector<1x32x256xf32>
    %2 = vector.shape_cast %1 : vector<1x32x256xf32> to vector<32x256xf32>
    %cst = arith.constant dense<0.000000e+00> : vector<32x256xf32>
    %3 = tpu.matmul %0, %2, %cst {dimension_numbers = #tpu.dot_dimension_numbers<[1], [0], [0], [1], [0, 0, 1, 1], [], []>} : vector<32x32xf32>, vector<32x256xf32>, vector<32x256xf32> -> vector<32x256xf32>
    %c0_4 = arith.constant 0 : index
    %c0_5 = arith.constant 0 : index
    %4 = vector.load %arg3[%c0_4, %c0_5] : memref<32x1xf32, #tpu.memory_space<vmem>>, vector<32x1xf32>
    %5 = vector.broadcast %4 : vector<32x1xf32> to vector<32x256xf32>
    %6 = arith.addf %3, %5 : vector<32x256xf32>
    %c0_6 = arith.constant 0 : index
    %c0_7 = arith.constant 0 : index
    %c0_8 = arith.constant 0 : index
    %7 = vector.load %arg5[%c0_6, %c0_7, %c0_8] : memref<1x32x256xf32, #tpu.memory_space<vmem>>, vector<1x32x256xf32>
    %8 = vector.shape_cast %7 : vector<1x32x256xf32> to vector<32x256xf32>
    %9 = vector.shape_cast %6 : vector<32x256xf32> to vector<1x32x256xf32>
    tpu.vector_store %arg5[%c0_6, %c0_7, %c0_8], %9 {strides = array<i32>} : memref<1x32x256xf32, #tpu.memory_space<vmem>>, vector<1x32x256xf32>,
    return
  }
  func.func @transform_0(%arg0: i32, %arg1: i32) -> (i32, i32) {
    %c0_i32 = arith.constant 0 : i32
    %c0_i32_0 = arith.constant 0 : i32
    %c0_i32_1 = arith.constant 0 : i32
    return %c0_i32, %c0_i32_0 : i32, i32
  }
  func.func @transform_1(%arg0: i32, %arg1: i32) -> (i32, i32) {
    %c0_i32 = arith.constant 0 : i32
    %c0_i32_0 = arith.constant 0 : i32
    %c0_i32_1 = arith.constant 0 : i32
    return %c0_i32, %c0_i32_0 : i32, i32
  }
  func.func @transform_2(%arg0: i32, %arg1: i32) -> (i32, i32, i32) {
    %c0_i32 = arith.constant 0 : i32
    %c0_i32_0 = arith.constant 0 : i32
    return %arg0, %c0_i32, %arg1 : i32, i32, i32
  }
  func.func @transform_3(%arg0: i32, %arg1: i32) -> (i32, i32, i32) {
    %c0_i32 = arith.constant 0 : i32
    %c0_i32_0 = arith.constant 0 : i32
    return %arg0, %c0_i32, %arg1 : i32, i32, i32
  }
}

</mosaic_0001>

<bundles_post_ra>
// kernel: tpu_custom_call.1
= control target key start
LH: loop header
LB: loop body
LE: loop exit
PB: predicated region body
PF: predicated region fallthrough
CT: control target
= control target key end

     0   :  { %8 = vsyncpa [#allocation3], 0  ;;  %s873_s0 = inlined_call_operand.vmem [shape: f32[32,32], index: 0, kind: input, shape index: {}]   ;;  %s874_s1 = inlined_call_operand.vmem [shape: f32[32,1], index: 1, kind: input, shape index: {}]   ;;  %s875_s2 = inlined_call_operand.hbm [shape: f32[2,32,256], index: 2, kind: input, shape index: {}]   ;;  %s876_s3 = inlined_call_operand.hbm [shape: f32[2,32,256], index: 3, kind: output, shape index: {}]  }
   0x1   :  { %10 = vsyncpa [#allocation3 + $0x1], 0 }
   0x2   :  { %11 = vsyncpa [#allocation4], 0 }
   0x3   :  { %13 = vsyncpa [#allocation4 + $0x1], 0  ;;  %s695_s12 = smov 0   ;;  %s697_s13 = smov 0  }
   0x4   :  { %s699_s14 = smov 0   ;;  %s701_s15 = smov 0  }
   0x5   :  { %s703_s16 = smov 0   ;;  %s705_s17 = smov 0  }
   0x6 LB: > { %s458_s18 = sadd.s32 4294967295, %s665_s17   ;;  %s459_s19 = sadd.s32 4294967294, %s665_s17   ;;  %s665_s17 = sphi %s705_s17, %s19_s17   ;;  %s661_s16 = sphi %s703_s16, %s887_s16   ;;  %s657_s15 = sphi %s701_s15, %s886_s15   ;;  %s653_s14 = sphi %s699_s14, %s885_s14   ;;  %s649_s13 = sphi %s697_s13, %s884_s13   ;;  %s645_s12 = sphi %s695_s12, %s883_s12  }
   0x7   : > { %s31_s20 = sadd.s32 1, %s661_s16  ;;  %s82_s21 = sadd.s32 1, %s653_s14 }
   0x8   : > { %p33_p0 = scmp.ge.s32.totalorder %s31_s20, 2  ;;  %p89_p1 = scmp.ne.s32.totalorder %s653_s14, %s649_s13 }
   0x9   : > { %p90_p2 = scmp.eq.s32.totalorder %s665_s17, 0  ;;  %p95_p3 = scmp.ne.s32.totalorder %s649_s13, %s645_s12 }
   0xa   : > { %s889_s20 = smov (%p33_p0, %s31_s20), 0  ;;  %p96_p5 = scmp.eq.s32.totalorder %s458_s18, 0 }
   0xb   : > { %p736_p4 = por %p90_p2, %p89_p1  ;;  %s77_s23 = ssub.s32 %s661_s16, %s889_s20 }
   0xc   : > { %p121_p6 = scmp.eq.s32.totalorder %s458_s18, 1  ;;  %p80_p7 = scmp.eq.s32.totalorder %s77_s23, 0 }
   0xd   : > { %p742_p8 = por %p96_p5, %p95_p3  ;;  %p127_p10 = scmp.eq.s32.totalorder %s459_s19, 1 }
   0xe   : > { %p746_p9 = por %p121_p6, %p89_p1  ;;  %p499_p13 = scmp.lt.s32.totalorder %s665_s17, 2 }
   0xf   : > { %s751_s26 = scalar_select %p80_p7, %s653_s14, %s82_s21  }
  0x10   : > { %p753_p11 = por %p127_p10, %p95_p3  ;;  %s153_s28 = sand.u32 1, %s653_s14  }
  0x11   : > { %s462_s29 = sshll.u32 %s153_s28, 6  ;;  %s477_s30 = sshll.u32 %s661_s16, 10 }
  0x12   : > { %s165_s6 = scalar_lea.hbm %s875_s2, %s477_s30  ;;  %s157_s7 = scalar_lea.vmem [#allocation2], %s462_s29 }
  0x13   : > { %s166_s8 = sshll.u32 %s157_s7, 4  ;;  %p766_p0 = pnand %p499_p13, %p736_p4  ;;  %s167_s8 = int_to_ptr.vmem [resolvable:$true] %s166_s8 }
  0x14   : > { %p465_p1 = scmp.ge.s32.totalorder %s665_s17, 1  ;;  %s154_s10 = scalar_lea.sflag [#allocation3], %s153_s28 }
  0x15   : > { %p559_p2 = pneg %p766_p0  ;;  %s570_s11 = scalar_lea.vmem %s167_s8, 1024 }
  0x16   : > { %p571_p3 = scmp.ne.s32.totalorder %s167_s8, %s570_s11  ;;  %s667_s18 = smov [#allocation2]  }
  0x17   : > { %s575_s19 = sshll.u32 %s667_s18, 4  ;;  %s576_s19 = int_to_ptr.vmem [resolvable:$false] %s575_s19 }
  0x18   : > { %p573_p5 = pnand %p571_p3, %p559_p2  ;;  %s577_s21 = scalar_lea.vmem %s576_s19, 2048 }
  0x19   : > { %p578_p7 = scmp.lt.s32.totalorder %s167_s8, %s576_s19  ;;  %p579_p10 = scmp.lt.s32.totalorder %s577_s21, %s570_s11 }
  0x1a   : > { %p574_p6 = pneg %p573_p5 }
  0x1b   : > { %p580_p12 = por %p579_p10, %p578_p7 }
  0x1d   : > { %p581_p4 = pnand %p580_p12, %p574_p6 }
  0x1f   : > { %584 = shalt.err (!%p581_p4)
}
  0x20   : > { %s668_s22 = smov 256   ;;  %s669_s23 = smov 16  }
  0x21   : > { %494 = dma.hbm_to_vmem [thread:$0]  (!%p766_p0), %s165_s6, 1024, %s167_s8, %s154_s10, %s668_s22, %s668_s22, %s669_s23  }
  0x22   : > { %p174_p13 = scmp.lt.s32.totalorder %s665_s17, 3 }
  0x24   : > { %p175_p2 = pnand %p465_p1, %p174_p13 }
  0x25   : > { %s779_s28 = sand.u32 (!%p175_p2), 1, %s649_s13  }
  0x26   : > { %178 = sbr.rel (%p175_p2) target bundleno = 270 (0x10e), region = 32  ;;  %s466_s29 = sshll.u32 (!%p175_p2), %s779_s28, 6 }
  0x27   : > { %s181_s30 = scalar_lea.sflag (!%p175_p2), [#allocation3], %s779_s28  ;;  %s184_s4 = scalar_lea.vmem (!%p175_p2), [#allocation2], %s466_s29 }
  0x2b   : > { %636 = dma.done.wait (%p742_p8), %s181_s30, 1024  }
  0x2c   : > { %638 = vsyncadd (%p742_p8), %s181_s30, 4294966272  ;;  %v670_v0 = vmov 0.0   ;;  %v671_v1 = vmov 0   ;;  %v220_v2 = vld [vmem:[%s184_s4 + $0x38] sm:$0xff]  ;;  %v219_v3 = vld [vmem:[%s184_s4 + $0x30] sm:$0xff]  ;;  %vm245_vm0 = vcmask 261120  }
  0x2d   : > { %322 = vmatprep.mubr.f32.mxu0 %v670_v0  ;;  %334 = vmatprep.mubr.f32.mxu1 %v670_v0  ;;  %v218_v4 = vld [vmem:[%s184_s4 + $0x28] sm:$0xff]  ;;  %v217_v5 = vld [vmem:[%s184_s4 + $0x20] sm:$0xff]  ;;  %v216_v6 = vld [vmem:[%s184_s4 + $0x18] sm:$0xff]  ;;  %s206_s5 = scalar_lea.vmem [#allocation5], %s466_s29  ;;  %s478_s7 = sshll.u32 %s657_s15, 10 }
  0x2e   : > { %556 = vset.pattern.permute.xlu1 %v671_v1  ;;  %555 = vset.pattern.permute.xlu0 %v671_v1  ;;  %v215_v7 = vld [vmem:[%s184_s4 + $0x10] sm:$0xff]  ;;  %v214_v8 = vld [vmem:[%s184_s4 + $0x8] sm:$0xff]  ;;  %v213_v9 = vld [vmem:[%s184_s4] sm:$0xff]  ;;  %s371_s6 = sshll.u32 %s206_s5, 4  ;;  %s825_s9 = scalar_lea.hbm %s876_s3, %s478_s7  ;;  %s820_s6 = int_to_ptr.vmem [resolvable:$true] %s371_s6 }
  0x2f   : > { %282 = vmatprep.subr.mxu0 %v220_v2  ;;  %479 = vmatprep.subr.mxu1 %v220_v2  ;;  %v209_v10 = vld [vmem:[%s873_s0] sm:$0xff]  ;;  %v211_v11 = vld [vmem:[%s873_s0 + $0x10] sm:$0xff]  ;;  %v210_v14 = vld [vmem:[%s873_s0 + $0x8] sm:$0xff]  ;;  %s356_s15 = scalar_lea.sflag [#allocation4], %s779_s28  ;;  %s585_s10 = scalar_lea.vmem %s820_s6, 1024 }
  0x30   : > { %283 = vmatpush1.msra.mxu0 %v219_v3  ;;  %483 = vmatpush1.msra.mxu1 %v219_v3  ;;  %v223_v12 = vld [vmem:[%s874_s1 + $0x10] sm:$0xff]  ;;  %v221_v13 = vld [vmem:[%s874_s1] sm:$0xff]  ;;  %v212_v15 = vld [vmem:[%s873_s0 + $0x18] sm:$0xff]  ;;  %p586_p8 = scmp.ne.s32.totalorder %s820_s6, %s585_s10  ;;  %s672_s11 = smov [#allocation5]  }
  0x31   : > { %284 = vmatprep.subr.mxu0 %v218_v4  ;;  %480 = vmatprep.subr.mxu1 %v218_v4  ;;  %v224_v16 = vld [vmem:[%s874_s1 + $0x18] sm:$0xff]  ;;  %v222_v17 = vld [vmem:[%s874_s1 + $0x8] sm:$0xff]  ;;  %s589_s18 = sshll.u32 %s672_s11, 4  ;;  %s590_s18 = int_to_ptr.vmem [resolvable:$false] %s589_s18 }
  0x32   : > { %285 = vmatpush1.msra.mxu0 %v217_v5  ;;  %484 = vmatpush1.msra.mxu1 %v217_v5  ;;  %p587_p12 = pnand %p586_p8, %p746_p9  ;;  %s591_s19 = scalar_lea.vmem %s590_s18, 2048 }
  0x33   : > { %286 = vmatprep.subr.mxu0 %v216_v6  ;;  %481 = vmatprep.subr.mxu1 %v216_v6  ;;  %p592_p1 = scmp.lt.s32.totalorder %s820_s6, %s590_s18  ;;  %p593_p3 = scmp.lt.s32.totalorder %s591_s19, %s585_s10 }
  0x34   : > { %287 = vmatpush1.msra.mxu0 %v215_v7  ;;  %485 = vmatpush1.msra.mxu1 %v215_v7  ;;  %p588_p0 = pneg %p587_p12 }
  0x35   : > { %288 = vmatprep.subr.mxu0 %v214_v8  ;;  %482 = vmatprep.subr.mxu1 %v214_v8  ;;  %p594_p5 = por %p593_p3, %p592_p1 }
  0x36   : > { %289 = vmatpush1.msra.mxu0 %v213_v9  ;;  %486 = vmatpush1.msra.mxu1 %v213_v9 }
  0x37   : > { %468 = vmatmul.mubr.msk.f32.vlgmr.msra.gmra.mxu0 %vm245_vm0, %v209_v10  ;;  %470 = vmatmul.mubr.msk.f32.vlgmr.msra.gmra.mxu1 %vm245_vm0, %v211_v11  ;;  %p595_p6 = pnand %p594_p5, %p588_p0 }
  0x38   : > { %328 = vmatprep.mubr.f32.mxu0 %v670_v0  ;;  %340 = vmatprep.mubr.f32.mxu1 %v670_v0 }
  0x39   : > { %237 = vperm.xlu1 %556, %v223_v12   ;;  %227 = vperm.xlu0 %555, %v221_v13  }
  0x3b   : > { %469 = vmatmul.mubr.msk.f32.gmra.mxu0 %vm245_vm0, %v210_v14  ;;  %471 = vmatmul.mubr.msk.f32.gmra.mxu1 %vm245_vm0, %v212_v15 }
  0x3d   : > { %242 = vperm.xlu1 %556, %v224_v16   ;;  %232 = vperm.xlu0 %555, %v222_v17  }
  0xb4   : > { %v238_v18 = vpop.permute.xlu1 %237  ;;  %v228_v19 = vpop.permute.xlu0 %227 }
  0xb8   : > { %v243_v26 = vpop.permute.xlu1 %242  ;;  %v233_v27 = vpop.permute.xlu0 %232 }
  0xf7   : > { %v324_v20 = vpop.f32.mrf.mxu0  ;;  %v336_v21 = vpop.f32.mrf.mxu1 }
  0xf8   : > { %v325_v22 = vadd.f32 %v324_v20, %v228_v19  ;;  %v337_v23 = vadd.f32 %v336_v21, %v238_v18 }
  0xf9   : > { %v326_v24 = vpop.f32.mrf.mxu0  ;;  %v338_v25 = vpop.f32.mrf.mxu1 }
  0xfa   : > { %347 = vst [vmem:[%s206_s5] sm:$0xff] %v325_v22  ;;  %351 = vst [vmem:[%s206_s5 + $0x20] sm:$0xff] %v337_v23  ;;  %v327_v28 = vadd.f32 %v326_v24, %v228_v19  ;;  %v339_v29 = vadd.f32 %v338_v25, %v238_v18 }
  0xfb   : > { %v330_v30 = vpop.f32.mrf.mxu0  ;;  %v342_v31 = vpop.f32.mrf.mxu1 }
  0xfc   : > { %348 = vst [vmem:[%s206_s5 + $0x8] sm:$0xff] %v327_v28  ;;  %352 = vst [vmem:[%s206_s5 + $0x28] sm:$0xff] %v339_v29  ;;  %v331_v32 = vadd.f32 %v330_v30, %v233_v27  ;;  %v343_v33 = vadd.f32 %v342_v31, %v243_v26 }
  0xfd   : > { %v332_v34 = vpop.f32.mrf.mxu0  ;;  %v344_v35 = vpop.f32.mrf.mxu1 }
  0xfe   : > { %349 = vst [vmem:[%s206_s5 + $0x10] sm:$0xff] %v331_v32  ;;  %353 = vst [vmem:[%s206_s5 + $0x30] sm:$0xff] %v343_v33  ;;  %v333_v36 = vadd.f32 %v332_v34, %v233_v27  ;;  %v345_v37 = vadd.f32 %v344_v35, %v243_v26 }
 0x100   : > { %350 = vst [vmem:[%s206_s5 + $0x18] sm:$0xff] %v333_v36  ;;  %354 = vst [vmem:[%s206_s5 + $0x38] sm:$0xff] %v345_v37 }
 0x101   : > { %598 = shalt.err (!%p595_p6)
}
 0x102   : > { %s599_s21 = scalar_lea.hbm %s825_s9, 1024  ;;  %s603_s30 = scalar_lea.hbm %s876_s3, 2048 }
 0x103   : > { %p600_p7 = scmp.ne.s32.totalorder %s825_s9, %s599_s21  ;;  %p604_p13 = scmp.lt.s32.totalorder %s825_s9, %s876_s3 }
 0x104   : > { %p605_p2 = scmp.lt.s32.totalorder %s603_s30, %s599_s21 }
 0x105   : > { %p601_p10 = pnand %p600_p7, %p746_p9 }
 0x106   : > { %p606_p8 = por %p605_p2, %p604_p13 }
 0x107   : > { %p602_p4 = pneg %p601_p10 }
 0x109   : > { %p607_p12 = pnand %p606_p8, %p602_p4 }
 0x10b   : > { %610 = shalt.err (!%p607_p12)
}
 0x10c   : > { %s673_s5 = smov 256   ;;  %s674_s7 = smov 16  }
 0x10d   : > { %489 = dma.vmem_to_hbm [thread:$0]  (%p746_p9), %s820_s6, 1024, %s825_s9, %s356_s15, %s673_s5, %s673_s5, %s674_s7  }
 0x10e PF: > { %s386_s29 = sand.u32 1, %s645_s12   ;;  %p882_p0 = scmp.ge.s32.totalorder %s665_s17, 2 }
 0x10f   : > { %s387_s8 = scalar_lea.sflag [#allocation4], %s386_s29 }
 0x110   : > { %p496_p1 = pnand %p882_p0, %p753_p11 }
 0x112   : > { %p497_p3 = pneg %p496_p1 }
 0x114   : > { %640 = dma.done.wait (%p497_p3), %s387_s8, 1024  }
 0x115   : > { %642 = vsyncadd (%p497_p3), %s387_s8, 4294966272  ;;  %s19_s17 = sadd.s32 1, %s665_s17   ;;  %s883_s12 = smov %s649_s13 }
 0x116   : > { %p16_p5 = scmp.ge.s32.totalorder %s19_s17, 4   ;;  %s884_s13 = smov %s653_s14 }
 0x117   : > { %s885_s14 = smov %s751_s26  ;;  %s886_s15 = smov %s661_s16 }
 0x118   : > { %s887_s16 = smov %s889_s20  ;;  %18 = sbr.rel (!%p16_p5) target bundleno = 6 (0x6), region = 77 }
 0x11d   :  { %392 = vsyncpa [#allocation3], 1 }
 0x11e   :  { %394 = vsyncpa [#allocation3 + $0x1], 1 }
 0x11f   :  { %395 = vsyncpa [#allocation4], 1 }
 0x120   :  { %397 = vsyncpa [#allocation4 + $0x1], 1 }

</bundles_post_ra>
